<compile_context>
chip_gen: v5e
topology: v5e:2x2
jax: 0.10.0
libtpu: 0.0.40
codegen_flags: <defaults>
</compile_context>

<pallas_src>
import jax
import jax.numpy as jnp
from jax.experimental import pallas as pl
from jax.experimental.pallas import tpu as pltpu


def _dma_flatten_kernel(x_ref, o_ref, sem):
    # x_ref / o_ref are raw (b, flat) refs in pl.ANY (HBM).  One DMA-engine
    # copy, no VMEM staging, no TensorCore load/store work.
    cp = pltpu.make_async_copy(x_ref, o_ref, sem)
    cp.start()
    cp.wait()


# Below this many bytes the fixed pallas_call / launch overhead dwarfs the
# copy itself; the metadata-only reshape is strictly better.
_SMALL_BYTES = 256 * 1024


def flatten(x, *, force_kernel: bool = False):
    """Pallas equivalent of torch's x.view(x.size(0), -1).

    Default behaviour: return the metadata-only reshape (flatten costs
    nothing).  `force_kernel=True` (or large inputs) routes through a single
    HBM->HBM DMA pallas_call, kept only as an explicit materialization /
    fusion point.
    """
    b = x.shape[0]
    flat = 1
    for d in x.shape[1:]:
        flat *= d

    # Metadata-only, row-major flatten == torch .view(b, -1) on contiguous x.
    x2 = jnp.reshape(x, (b, flat))

    nbytes = b * flat * jnp.dtype(x.dtype).itemsize
    if not force_kernel and nbytes <= _SMALL_BYTES:
        # Production fast path: flatten is free, nothing to compute.
        return x2

    # Fusion-point form: one DMA, refs stay in HBM (pl.ANY), no grid, no
    # per-tile overhead, no VMEM budget involvement on any TPU generation.
    return pl.pallas_call(
        _dma_flatten_kernel,
        out_shape=jax.ShapeDtypeStruct((b, flat), x.dtype),
        in_specs=[pl.BlockSpec(memory_space=pl.ANY)],
        out_specs=pl.BlockSpec(memory_space=pl.ANY),
        scratch_shapes=[pltpu.SemaphoreType.DMA(())],
    )(x2)


if __name__ == "__main__":
    key = jax.random.PRNGKey(0)
    # Small shapes consistent with a conv-net feature map: NCHW = (2, 4, 16, 16)
    x = jax.random.normal(key, (2, 4, 16, 16), dtype=jnp.float32)

    ref = x.reshape(x.shape[0], -1)

    # 1) Default path (small input -> metadata-only reshape, no kernel).
    out_fast = jax.block_until_ready(flatten(x))
    assert out_fast.shape == ref.shape, (out_fast.shape, ref.shape)
    assert out_fast.dtype == ref.dtype, (out_fast.dtype, ref.dtype)
    assert bool(jnp.array_equal(out_fast, ref)), "Flatten fast-path mismatch"

    # 2) Kernel path (forced), exercising the single HBM->HBM DMA pallas_call.
    out_kernel = jax.block_until_ready(flatten(x, force_kernel=True))
    assert out_kernel.shape == ref.shape, (out_kernel.shape, ref.shape)
    assert out_kernel.dtype == ref.dtype, (out_kernel.dtype, ref.dtype)
    assert bool(jnp.array_equal(out_kernel, ref)), "Flatten kernel output mismatch"

    print("KERNEL_OK")
</pallas_src>

<mosaic_0001>
module attributes {stable_mosaic.version = 11 : i64} {
  func.func @_dma_flatten_kernel(%arg0: memref<2x1024xf32, #tpu.memory_space<any>>, %arg1: memref<2x1024xf32, #tpu.memory_space<any>>, %arg2: memref<!tpu.dma_semaphore, #tpu.memory_space<semaphore_mem>>) attributes {dimension_semantics = [], scalar_prefetch = 0 : i64, scratch_operands = 1 : i64, tpu.core_type = #tpu.core_type<tc>} {
    tpu.enqueue_dma source(%arg0 : memref<2x1024xf32, #tpu.memory_space<any>>) target(%arg1 : memref<2x1024xf32, #tpu.memory_space<any>>) target_semaphore(%arg2 : memref<!tpu.dma_semaphore, #tpu.memory_space<semaphore_mem>>)
    tpu.wait_dma2 semaphore(%arg2 : memref<!tpu.dma_semaphore, #tpu.memory_space<semaphore_mem>>) src(%arg0 : memref<2x1024xf32, #tpu.memory_space<any>>) dst(%arg1 : memref<2x1024xf32, #tpu.memory_space<any>>)
    return
  }
}

</mosaic_0001>

<bundles_post_ra>
// kernel: tpu_custom_call.1
= control target key start
LH: loop header
LB: loop body
LE: loop exit
PB: predicated region body
PF: predicated region fallthrough
CT: control target
= control target key end

     0   :  { %s33_s12 = smov [#allocation2]   ;;  %s34_s13 = smov [#allocation3]   ;;  %s52_s0 = inlined_call_operand.hbm [shape: f32[2,1024], index: 0, kind: input, shape index: {}]   ;;  %s53_s1 = inlined_call_operand.hbm [shape: f32[2,1024], index: 1, kind: output, shape index: {}]  }
   0x1   :  { %s10_s8 = sshll.u32 %s52_s0, 4  ;;  %s12_s11 = sshll.u32 %s53_s1, 4  ;;  %s11_s8 = int_to_ptr.hbm [resolvable:$true] %s10_s8  ;;  %s13_s11 = int_to_ptr.hbm [resolvable:$true] %s12_s11 }
   0x2   :  { %s35_s14 = smov 0  }
   0x3   :  { %16 = dma.general %s11_s8, 256, %s13_s11, %s33_s12, %s34_s13, [#allocation4], %s35_s14, 0  }
   0x4   :  { %31 = dma.done.wait [#allocation2], 256 }
   0x5   :  { %32 = vsyncadd [#allocation2], 4294967040 }
   0x6   :  { %21 = vsyncmov [#allocation2] }
   0x9   :  { %s22_s15 = vpop.sfrf %21 }
   0xa   :  { %p27_p0 = scmp.ne.s32.totalorder %s22_s15, 0 }
   0xc   :  { %26 = shalt.err (%p27_p0)  }

</bundles_post_ra>
